<compile_context>
chip_gen: v7x
topology: tpu7x:2x2x1
jax: 0.10.0
libtpu: 0.0.40
codegen_flags: <defaults>
</compile_context>

<pallas_src>
import functools

import jax
import jax.numpy as jnp
from jax.experimental import pallas as pl
from jax.experimental.pallas import tpu as pltpu


# ----------------------------------------------------------------------------
# Activation helpers (PyTorch-matching semantics).
# ----------------------------------------------------------------------------
def _make_act(activation):
    if activation == "relu":
        return lambda h: jnp.maximum(h, 0.0)
    if activation == "lrelu":
        return lambda h: jnp.where(h > 0, h, 0.01 * h)  # nn.LeakyReLU default slope
    raise ValueError(f"unknown activation: {activation}")


# ----------------------------------------------------------------------------
# Pallas kernel: MLP tail (hidden layers + width-1 output) on ti*Bp pair rows.
# ----------------------------------------------------------------------------
def _make_pair_mlp_kernel(num_hidden_layers, activation, rows_per_block, b_padded):
    """Ref layout per grid step:
      hx_ref : (rows_per_block, H) f32  block of  x @ W1[:dim] + b1
      hy_ref : (b_padded, H)       f32  full      y @ W1[dim:]   (resident)
      then alternating (W_k bf16 (H,H), b_k f32 (1,H)) for each hidden layer,
      then w_out f32 (1,H), b_out f32 (1,1),
      out_ref: (rows_per_block * b_padded, 1) f32
    """
    act = _make_act(activation)

    def kernel(hx_ref, hy_ref, *refs):
        out_ref = refs[-1]
        w = refs[:-1]

        # Hoist all weight loads out of the unrolled row loop.
        hy = hy_ref[...]                                   # (Bp, H) f32
        hidden = []
        idx = 0
        for _ in range(num_hidden_layers):
            hidden.append((w[idx][...], w[idx + 1][...]))  # (H,H) bf16, (1,H) f32
            idx += 2
        w_out = w[idx][...]                                # (1, H) f32
        b_out = w[idx + 1][...]                            # (1, 1) f32

        for i in range(rows_per_block):                    # compile-time unroll
            # First layer: broadcast-add of the split-W1 products (f32) + act.
            h = act(hy + hx_ref[i:i + 1, :])               # (Bp, H)
            # Hidden layers: bf16 MXU matmuls, f32 accumulation, f32 bias/act.
            for (wk, bk) in hidden:
                h = jnp.dot(h.astype(wk.dtype), wk,
                            preferred_element_type=jnp.float32) + bk
                h = act(h)
            # Output layer (width 1): VPU multiply + lane reduction, f32.
            s = jnp.sum(h * w_out, axis=-1, keepdims=True) + b_out   # (Bp, 1)
            out_ref[i * b_padded:(i + 1) * b_padded, :] = s.astype(out_ref.dtype)

    return kernel


# ----------------------------------------------------------------------------
# Wrapper: split-W1 precompute (glue) + pallas_call.
# ----------------------------------------------------------------------------
def concat_critic_forward(x, y, params, *, layers, activation="relu",
                          rows_per_block=8, vmem_limit_bytes=None):
    """params: list of (W [in,out], b [1,out]) for each Linear, in order.

    Returns out[i, j] = f(concat(x[i], y[j])) -- identical to the PyTorch
    ConcatCritic.forward output (which is already transposed).
    """
    B, dim = x.shape
    assert len(params) == layers + 2, "expected first + `layers` hidden + output Linear"
    H = params[0][0].shape[1]
    f32 = jnp.float32

    # Split first Linear:  concat(x_i, y_j) @ W1 + b1 == hx[i] + hy[j].
    w1 = params[0][0].astype(f32)
    b1 = params[0][1].astype(f32).reshape(1, H)
    hx = x.astype(f32) @ w1[:dim] + b1                 # (B, H), bias folded in
    hy = y.astype(f32) @ w1[dim:]                      # (B, H)

    # Pad the batch to a sublane multiple so blocks tile cleanly (padded rows /
    # cols are computed on zeros and sliced away afterwards).
    b_pad = ((B + 7) // 8) * 8
    if b_pad != B:
        hx = jnp.pad(hx, ((0, b_pad - B), (0, 0)))
        hy = jnp.pad(hy, ((0, b_pad - B), (0, 0)))

    # Row tile over the x index: multiple of 8 that divides the padded batch.
    ti = max(8, (rows_per_block // 8) * 8)
    ti = min(ti, b_pad)
    if b_pad % ti != 0:
        ti = 8

    # Hidden weights in bf16 (MXU native); biases and output layer in f32.
    flat = []
    for (wk, bk) in params[1:-1]:
        flat.append(wk.astype(jnp.bfloat16))
        flat.append(bk.astype(f32).reshape(1, H))
    w_out, b_out = params[-1]
    flat.append(w_out.astype(f32).reshape(1, H))       # (H,1) -> (1,H) row vector
    flat.append(b_out.astype(f32).reshape(1, 1))

    kernel = _make_pair_mlp_kernel(layers, activation, ti, b_pad)

    weight_specs = [pl.BlockSpec(p.shape, lambda g: (0, 0)) for p in flat]
    in_specs = [pl.BlockSpec((ti, H), lambda g: (g, 0)),      # hx block per step
                pl.BlockSpec((b_pad, H), lambda g: (0, 0)),   # hy resident
                ] + weight_specs

    compiler_kwargs = dict(dimension_semantics=("parallel",))
    if vmem_limit_bytes is not None:
        compiler_kwargs["vmem_limit_bytes"] = vmem_limit_bytes

    scores = pl.pallas_call(
        kernel,
        out_shape=jax.ShapeDtypeStruct((b_pad * b_pad, 1), f32),
        grid=(b_pad // ti,),
        in_specs=in_specs,
        out_specs=pl.BlockSpec((ti * b_pad, 1), lambda g: (g, 0)),
        compiler_params=pltpu.CompilerParams(**compiler_kwargs),
    )(hx, hy, *flat)

    # Rows were generated i-major / j-minor, so this reshape (no transpose, no
    # data movement) already gives out[i, j] = f(concat(x[i], y[j])).
    return scores.reshape(b_pad, b_pad)[:B, :B]


# ----------------------------------------------------------------------------
# Deterministic parameter init (PyTorch nn.Linear-style uniform bounds).
# ----------------------------------------------------------------------------
def init_concat_critic_params(key, dim, hidden_dim, layers):
    def init_linear(k, fan_in, fan_out):
        kw, kb = jax.random.split(k)
        bound = 1.0 / jnp.sqrt(jnp.float32(fan_in))
        w = jax.random.uniform(kw, (fan_in, fan_out), jnp.float32, -bound, bound)
        b = jax.random.uniform(kb, (1, fan_out), jnp.float32, -bound, bound)
        return w, b

    sizes = [(2 * dim, hidden_dim)]
    sizes += [(hidden_dim, hidden_dim)] * layers
    sizes += [(hidden_dim, 1)]

    params = []
    for fan_in, fan_out in sizes:
        key, sub = jax.random.split(key)
        params.append(init_linear(sub, fan_in, fan_out))
    return params


# ----------------------------------------------------------------------------
# Pure-JAX f32 reference (mirrors the PyTorch module exactly).
# ----------------------------------------------------------------------------
def _reference(x, y, params, *, layers, activation="relu"):
    B, dim = x.shape
    act = _make_act(activation)
    x_tiled = jnp.stack([x] * B, axis=0)                     # x_tiled[i, j] = x[j]
    y_tiled = jnp.stack([y] * B, axis=1)                     # y_tiled[i, j] = y[i]
    h = jnp.concatenate([x_tiled, y_tiled], axis=2).reshape(B * B, 2 * dim)
    for i, (w, b) in enumerate(params):
        h = h @ w + b.reshape(1, -1)
        if i < len(params) - 1:
            h = act(h)
    return h.reshape(B, B).T


if __name__ == "__main__":
    B, dim, hidden_dim, layers = 8, 16, 32, 2
    activation = "relu"

    key = jax.random.PRNGKey(0)
    kx, ky, kp = jax.random.split(key, 3)
    x = jax.random.normal(kx, (B, dim), jnp.float32)
    y = jax.random.normal(ky, (B, dim), jnp.float32)
    params = init_concat_critic_params(kp, dim, hidden_dim, layers)

    fwd = jax.jit(functools.partial(
        concat_critic_forward, layers=layers, activation=activation))
    out = jax.block_until_ready(fwd(x, y, params))

    ref = _reference(x, y, params, layers=layers, activation=activation)
    assert out.shape == (B, B)
    # bf16 matmuls with f32 accumulation vs pure-f32 reference -> small tolerance.
    assert jnp.allclose(out, ref, atol=5e-2, rtol=5e-2), "mismatch vs reference"

    print("KERNEL_OK")
</pallas_src>

<mosaic_0001>
module attributes {stable_mosaic.version = 11 : i64} {
  func.func @kernel(%arg0: i32, %arg1: memref<8x32xf32, #tpu.memory_space<vmem>>, %arg2: memref<8x32xf32, #tpu.memory_space<vmem>>, %arg3: memref<32x32xbf16, #tpu.memory_space<vmem>>, %arg4: memref<1x32xf32, #tpu.memory_space<vmem>>, %arg5: memref<32x32xbf16, #tpu.memory_space<vmem>>, %arg6: memref<1x32xf32, #tpu.memory_space<vmem>>, %arg7: memref<1x32xf32, #tpu.memory_space<vmem>>, %arg8: memref<1x1xf32, #tpu.memory_space<vmem>>, %arg9: memref<64x1xf32, #tpu.memory_space<vmem>>) attributes {dimension_semantics = [#tpu.dimension_semantics<parallel>], iteration_bounds = array<i64: 1>, scalar_prefetch = 0 : i64, scratch_operands = 0 : i64, tpu.core_type = #tpu.core_type<tc>, window_params = [{transform_indices = @transform_0, window_bounds = array<i64: 8, 32>}, {pipeline_mode = #tpu.pipeline_mode<synchronous>, transform_indices = @transform_1, window_bounds = array<i64: 8, 32>}, {pipeline_mode = #tpu.pipeline_mode<synchronous>, transform_indices = @transform_2, window_bounds = array<i64: 32, 32>}, {pipeline_mode = #tpu.pipeline_mode<synchronous>, transform_indices = @transform_3, window_bounds = array<i64: 1, 32>}, {pipeline_mode = #tpu.pipeline_mode<synchronous>, transform_indices = @transform_4, window_bounds = array<i64: 32, 32>}, {pipeline_mode = #tpu.pipeline_mode<synchronous>, transform_indices = @transform_5, window_bounds = array<i64: 1, 32>}, {pipeline_mode = #tpu.pipeline_mode<synchronous>, transform_indices = @transform_6, window_bounds = array<i64: 1, 32>}, {pipeline_mode = #tpu.pipeline_mode<synchronous>, transform_indices = @transform_7, window_bounds = array<i64: 1, 1>}, {transform_indices = @transform_8, window_bounds = array<i64: 64, 1>}]} {
    %c0 = arith.constant 0 : index
    %c0_0 = arith.constant 0 : index
    %0 = vector.load %arg2[%c0, %c0_0] : memref<8x32xf32, #tpu.memory_space<vmem>>, vector<8x32xf32>
    %c0_1 = arith.constant 0 : index
    %c0_2 = arith.constant 0 : index
    %1 = vector.load %arg3[%c0_1, %c0_2] : memref<32x32xbf16, #tpu.memory_space<vmem>>, vector<32x32xbf16>
    %c0_3 = arith.constant 0 : index
    %c0_4 = arith.constant 0 : index
    %2 = vector.load %arg4[%c0_3, %c0_4] : memref<1x32xf32, #tpu.memory_space<vmem>>, vector<1x32xf32>
    %c0_5 = arith.constant 0 : index
    %c0_6 = arith.constant 0 : index
    %3 = vector.load %arg5[%c0_5, %c0_6] : memref<32x32xbf16, #tpu.memory_space<vmem>>, vector<32x32xbf16>
    %c0_7 = arith.constant 0 : index
    %c0_8 = arith.constant 0 : index
    %4 = vector.load %arg6[%c0_7, %c0_8] : memref<1x32xf32, #tpu.memory_space<vmem>>, vector<1x32xf32>
    %c0_9 = arith.constant 0 : index
    %c0_10 = arith.constant 0 : index
    %5 = vector.load %arg7[%c0_9, %c0_10] : memref<1x32xf32, #tpu.memory_space<vmem>>, vector<1x32xf32>
    %c0_11 = arith.constant 0 : index
    %c0_12 = arith.constant 0 : index
    %6 = vector.load %arg8[%c0_11, %c0_12] : memref<1x1xf32, #tpu.memory_space<vmem>>, vector<1x1xf32>
    %c0_13 = arith.constant 0 : index
    %c0_14 = arith.constant 0 : index
    %7 = vector.load %arg1[%c0_13, %c0_14] : memref<8x32xf32, #tpu.memory_space<vmem>>, vector<1x32xf32>
    %8 = vector.broadcast %7 : vector<1x32xf32> to vector<8x32xf32>
    %9 = arith.addf %0, %8 : vector<8x32xf32>
    %cst = arith.constant 0.000000e+00 : f32
    %10 = vector.broadcast %cst : f32 to vector<8x32xf32>
    %11 = arith.maximumf %9, %10 : vector<8x32xf32>
    %12 = arith.truncf %11 : vector<8x32xf32> to vector<8x32xbf16>
    %cst_15 = arith.constant dense<0.000000e+00> : vector<8x32xf32>
    %13 = tpu.matmul %12, %1, %cst_15 {dimension_numbers = #tpu.dot_dimension_numbers<[1], [0], [0], [1], [0, 0, 1, 1], [], []>} : vector<8x32xbf16>, vector<32x32xbf16>, vector<8x32xf32> -> vector<8x32xf32>
    %14 = vector.broadcast %2 : vector<1x32xf32> to vector<8x32xf32>
    %15 = arith.addf %13, %14 : vector<8x32xf32>
    %cst_16 = arith.constant 0.000000e+00 : f32
    %16 = vector.broadcast %cst_16 : f32 to vector<8x32xf32>
    %17 = arith.maximumf %15, %16 : vector<8x32xf32>
    %18 = arith.truncf %17 : vector<8x32xf32> to vector<8x32xbf16>
    %cst_17 = arith.constant dense<0.000000e+00> : vector<8x32xf32>
    %19 = tpu.matmul %18, %3, %cst_17 {dimension_numbers = #tpu.dot_dimension_numbers<[1], [0], [0], [1], [0, 0, 1, 1], [], []>} : vector<8x32xbf16>, vector<32x32xbf16>, vector<8x32xf32> -> vector<8x32xf32>
    %20 = vector.broadcast %4 : vector<1x32xf32> to vector<8x32xf32>
    %21 = arith.addf %19, %20 : vector<8x32xf32>
    %cst_18 = arith.constant 0.000000e+00 : f32
    %22 = vector.broadcast %cst_18 : f32 to vector<8x32xf32>
    %23 = arith.maximumf %21, %22 : vector<8x32xf32>
    %24 = vector.broadcast %5 : vector<1x32xf32> to vector<8x32xf32>
    %25 = arith.mulf %23, %24 : vector<8x32xf32>
    %cst_19 = arith.constant dense<0.000000e+00> : vector<8xf32>
    %26 = vector.multi_reduction <add>, %25, %cst_19 [1] : vector<8x32xf32> to vector<8xf32>
    %27 = vector.shape_cast %26 : vector<8xf32> to vector<8x1xf32>
    %28 = vector.broadcast %6 : vector<1x1xf32> to vector<8x1xf32>
    %29 = arith.addf %27, %28 : vector<8x1xf32>
    %c0_20 = arith.constant 0 : index
    %c0_21 = arith.constant 0 : index
    %30 = vector.load %arg9[%c0_20, %c0_21] : memref<64x1xf32, #tpu.memory_space<vmem>>, vector<8x1xf32>
    tpu.vector_store %arg9[%c0_20, %c0_21], %29 {strides = array<i32>} : memref<64x1xf32, #tpu.memory_space<vmem>>, vector<8x1xf32>,
    %c1 = arith.constant 1 : index
    %c0_22 = arith.constant 0 : index
    %31 = vector.load %arg1[%c1, %c0_22] : memref<8x32xf32, #tpu.memory_space<vmem>>, vector<1x32xf32>
    %32 = vector.broadcast %31 : vector<1x32xf32> to vector<8x32xf32>
    %33 = arith.addf %0, %32 : vector<8x32xf32>
    %cst_23 = arith.constant 0.000000e+00 : f32
    %34 = vector.broadcast %cst_23 : f32 to vector<8x32xf32>
    %35 = arith.maximumf %33, %34 : vector<8x32xf32>
    %36 = arith.truncf %35 : vector<8x32xf32> to vector<8x32xbf16>
    %cst_24 = arith.constant dense<0.000000e+00> : vector<8x32xf32>
    %37 = tpu.matmul %36, %1, %cst_24 {dimension_numbers = #tpu.dot_dimension_numbers<[1], [0], [0], [1], [0, 0, 1, 1], [], []>} : vector<8x32xbf16>, vector<32x32xbf16>, vector<8x32xf32> -> vector<8x32xf32>
    %38 = vector.broadcast %2 : vector<1x32xf32> to vector<8x32xf32>
    %39 = arith.addf %37, %38 : vector<8x32xf32>
    %cst_25 = arith.constant 0.000000e+00 : f32
    %40 = vector.broadcast %cst_25 : f32 to vector<8x32xf32>
    %41 = arith.maximumf %39, %40 : vector<8x32xf32>
    %42 = arith.truncf %41 : vector<8x32xf32> to vector<8x32xbf16>
    %cst_26 = arith.constant dense<0.000000e+00> : vector<8x32xf32>
    %43 = tpu.matmul %42, %3, %cst_26 {dimension_numbers = #tpu.dot_dimension_numbers<[1], [0], [0], [1], [0, 0, 1, 1], [], []>} : vector<8x32xbf16>, vector<32x32xbf16>, vector<8x32xf32> -> vector<8x32xf32>
    %44 = vector.broadcast %4 : vector<1x32xf32> to vector<8x32xf32>
    %45 = arith.addf %43, %44 : vector<8x32xf32>
    %cst_27 = arith.constant 0.000000e+00 : f32
    %46 = vector.broadcast %cst_27 : f32 to vector<8x32xf32>
    %47 = arith.maximumf %45, %46 : vector<8x32xf32>
    %48 = vector.broadcast %5 : vector<1x32xf32> to vector<8x32xf32>
    %49 = arith.mulf %47, %48 : vector<8x32xf32>
    %cst_28 = arith.constant dense<0.000000e+00> : vector<8xf32>
    %50 = vector.multi_reduction <add>, %49, %cst_28 [1] : vector<8x32xf32> to vector<8xf32>
    %51 = vector.shape_cast %50 : vector<8xf32> to vector<8x1xf32>
    %52 = vector.broadcast %6 : vector<1x1xf32> to vector<8x1xf32>
    %53 = arith.addf %51, %52 : vector<8x1xf32>
    %c8 = arith.constant 8 : index
    %c0_29 = arith.constant 0 : index
    %54 = vector.load %arg9[%c8, %c0_29] : memref<64x1xf32, #tpu.memory_space<vmem>>, vector<8x1xf32>
    tpu.vector_store %arg9[%c8, %c0_29], %53 {strides = array<i32>} : memref<64x1xf32, #tpu.memory_space<vmem>>, vector<8x1xf32>,
    %c2 = arith.constant 2 : index
    %c0_30 = arith.constant 0 : index
    %55 = vector.load %arg1[%c2, %c0_30] : memref<8x32xf32, #tpu.memory_space<vmem>>, vector<1x32xf32>
    %56 = vector.broadcast %55 : vector<1x32xf32> to vector<8x32xf32>
    %57 = arith.addf %0, %56 : vector<8x32xf32>
    %cst_31 = arith.constant 0.000000e+00 : f32
    %58 = vector.broadcast %cst_31 : f32 to vector<8x32xf32>
    %59 = arith.maximumf %57, %58 : vector<8x32xf32>
    %60 = arith.truncf %59 : vector<8x32xf32> to vector<8x32xbf16>
    %cst_32 = arith.constant dense<0.000000e+00> : vector<8x32xf32>
    %61 = tpu.matmul %60, %1, %cst_32 {dimension_numbers = #tpu.dot_dimension_numbers<[1], [0], [0], [1], [0, 0, 1, 1], [], []>} : vector<8x32xbf16>, vector<32x32xbf16>, vector<8x32xf32> -> vector<8x32xf32>
    %62 = vector.broadcast %2 : vector<1x32xf32> to vector<8x32xf32>
    %63 = arith.addf %61, %62 : vector<8x32xf32>
    %cst_33 = arith.constant 0.000000e+00 : f32
    %64 = vector.broadcast %cst_33 : f32 to vector<8x32xf32>
    %65 = arith.maximumf %63, %64 : vector<8x32xf32>
    %66 = arith.truncf %65 : vector<8x32xf32> to vector<8x32xbf16>
    %cst_34 = arith.constant dense<0.000000e+00> : vector<8x32xf32>
    %67 = tpu.matmul %66, %3, %cst_34 {dimension_numbers = #tpu.dot_dimension_numbers<[1], [0], [0], [1], [0, 0, 1, 1], [], []>} : vector<8x32xbf16>, vector<32x32xbf16>, vector<8x32xf32> -> vector<8x32xf32>
    %68 = vector.broadcast %4 : vector<1x32xf32> to vector<8x32xf32>
    %69 = arith.addf %67, %68 : vector<8x32xf32>
    %cst_35 = arith.constant 0.000000e+00 : f32
    %70 = vector.broadcast %cst_35 : f32 to vector<8x32xf32>
    %71 = arith.maximumf %69, %70 : vector<8x32xf32>
    %72 = vector.broadcast %5 : vector<1x32xf32> to vector<8x32xf32>
    %73 = arith.mulf %71, %72 : vector<8x32xf32>
    %cst_36 = arith.constant dense<0.000000e+00> : vector<8xf32>
    %74 = vector.multi_reduction <add>, %73, %cst_36 [1] : vector<8x32xf32> to vector<8xf32>
    %75 = vector.shape_cast %74 : vector<8xf32> to vector<8x1xf32>
    %76 = vector.broadcast %6 : vector<1x1xf32> to vector<8x1xf32>
    %77 = arith.addf %75, %76 : vector<8x1xf32>
    %c16 = arith.constant 16 : index
    %c0_37 = arith.constant 0 : index
    %78 = vector.load %arg9[%c16, %c0_37] : memref<64x1xf32, #tpu.memory_space<vmem>>, vector<8x1xf32>
    tpu.vector_store %arg9[%c16, %c0_37], %77 {strides = array<i32>} : memref<64x1xf32, #tpu.memory_space<vmem>>, vector<8x1xf32>,
    %c3 = arith.constant 3 : index
    %c0_38 = arith.constant 0 : index
    %79 = vector.load %arg1[%c3, %c0_38] : memref<8x32xf32, #tpu.memory_space<vmem>>, vector<1x32xf32>
    %80 = vector.broadcast %79 : vector<1x32xf32> to vector<8x32xf32>
    %81 = arith.addf %0, %80 : vector<8x32xf32>
    %cst_39 = arith.constant 0.000000e+00 : f32
    %82 = vector.broadcast %cst_39 : f32 to vector<8x32xf32>
    %83 = arith.maximumf %81, %82 : vector<8x32xf32>
    %84 = arith.truncf %83 : vector<8x32xf32> to vector<8x32xbf16>
    %cst_40 = arith.constant dense<0.000000e+00> : vector<8x32xf32>
    %85 = tpu.matmul %84, %1, %cst_40 {dimension_numbers = #tpu.dot_dimension_numbers<[1], [0], [0], [1], [0, 0, 1, 1], [], []>} : vector<8x32xbf16>, vector<32x32xbf16>, vector<8x32xf32> -> vector<8x32xf32>
    %86 = vector.broadcast %2 : vector<1x32xf32> to vector<8x32xf32>
    %87 = arith.addf %85, %86 : vector<8x32xf32>
    %cst_41 = arith.constant 0.000000e+00 : f32
    %88 = vector.broadcast %cst_41 : f32 to vector<8x32xf32>
    %89 = arith.maximumf %87, %88 : vector<8x32xf32>
    %90 = arith.truncf %89 : vector<8x32xf32> to vector<8x32xbf16>
    %cst_42 = arith.constant dense<0.000000e+00> : vector<8x32xf32>
    %91 = tpu.matmul %90, %3, %cst_42 {dimension_numbers = #tpu.dot_dimension_numbers<[1], [0], [0], [1], [0, 0, 1, 1], [], []>} : vector<8x32xbf16>, vector<32x32xbf16>, vector<8x32xf32> -> vector<8x32xf32>
    %92 = vector.broadcast %4 : vector<1x32xf32> to vector<8x32xf32>
    %93 = arith.addf %91, %92 : vector<8x32xf32>
    %cst_43 = arith.constant 0.000000e+00 : f32
    %94 = vector.broadcast %cst_43 : f32 to vector<8x32xf32>
    %95 = arith.maximumf %93, %94 : vector<8x32xf32>
    %96 = vector.broadcast %5 : vector<1x32xf32> to vector<8x32xf32>
    %97 = arith.mulf %95, %96 : vector<8x32xf32>
    %cst_44 = arith.constant dense<0.000000e+00> : vector<8xf32>
    %98 = vector.multi_reduction <add>, %97, %cst_44 [1] : vector<8x32xf32> to vector<8xf32>
    %99 = vector.shape_cast %98 : vector<8xf32> to vector<8x1xf32>
    %100 = vector.broadcast %6 : vector<1x1xf32> to vector<8x1xf32>
    %101 = arith.addf %99, %100 : vector<8x1xf32>
    %c24 = arith.constant 24 : index
    %c0_45 = arith.constant 0 : index
    %102 = vector.load %arg9[%c24, %c0_45] : memref<64x1xf32, #tpu.memory_space<vmem>>, vector<8x1xf32>
    tpu.vector_store %arg9[%c24, %c0_45], %101 {strides = array<i32>} : memref<64x1xf32, #tpu.memory_space<vmem>>, vector<8x1xf32>,
    %c4 = arith.constant 4 : index
    %c0_46 = arith.constant 0 : index
    %103 = vector.load %arg1[%c4, %c0_46] : memref<8x32xf32, #tpu.memory_space<vmem>>, vector<1x32xf32>
    %104 = vector.broadcast %103 : vector<1x32xf32> to vector<8x32xf32>
    %105 = arith.addf %0, %104 : vector<8x32xf32>
    %cst_47 = arith.constant 0.000000e+00 : f32
    %106 = vector.broadcast %cst_47 : f32 to vector<8x32xf32>
    %107 = arith.maximumf %105, %106 : vector<8x32xf32>
    %108 = arith.truncf %107 : vector<8x32xf32> to vector<8x32xbf16>
    %cst_48 = arith.constant dense<0.000000e+00> : vector<8x32xf32>
    %109 = tpu.matmul %108, %1, %cst_48 {dimension_numbers = #tpu.dot_dimension_numbers<[1], [0], [0], [1], [0, 0, 1, 1], [], []>} : vector<8x32xbf16>, vector<32x32xbf16>, vector<8x32xf32> -> vector<8x32xf32>
    %110 = vector.broadcast %2 : vector<1x32xf32> to vector<8x32xf32>
    %111 = arith.addf %109, %110 : vector<8x32xf32>
    %cst_49 = arith.constant 0.000000e+00 : f32
    %112 = vector.broadcast %cst_49 : f32 to vector<8x32xf32>
    %113 = arith.maximumf %111, %112 : vector<8x32xf32>
    %114 = arith.truncf %113 : vector<8x32xf32> to vector<8x32xbf16>
    %cst_50 = arith.constant dense<0.000000e+00> : vector<8x32xf32>
    %115 = tpu.matmul %114, %3, %cst_50 {dimension_numbers = #tpu.dot_dimension_numbers<[1], [0], [0], [1], [0, 0, 1, 1], [], []>} : vector<8x32xbf16>, vector<32x32xbf16>, vector<8x32xf32> -> vector<8x32xf32>
    %116 = vector.broadcast %4 : vector<1x32xf32> to vector<8x32xf32>
    %117 = arith.addf %115, %116 : vector<8x32xf32>
    %cst_51 = arith.constant 0.000000e+00 : f32
    %118 = vector.broadcast %cst_51 : f32 to vector<8x32xf32>
    %119 = arith.maximumf %117, %118 : vector<8x32xf32>
    %120 = vector.broadcast %5 : vector<1x32xf32> to vector<8x32xf32>
    %121 = arith.mulf %119, %120 : vector<8x32xf32>
    %cst_52 = arith.constant dense<0.000000e+00> : vector<8xf32>
    %122 = vector.multi_reduction <add>, %121, %cst_52 [1] : vector<8x32xf32> to vector<8xf32>
    %123 = vector.shape_cast %122 : vector<8xf32> to vector<8x1xf32>
    %124 = vector.broadcast %6 : vector<1x1xf32> to vector<8x1xf32>
    %125 = arith.addf %123, %124 : vector<8x1xf32>
    %c32 = arith.constant 32 : index
    %c0_53 = arith.constant 0 : index
    %126 = vector.load %arg9[%c32, %c0_53] : memref<64x1xf32, #tpu.memory_space<vmem>>, vector<8x1xf32>
    tpu.vector_store %arg9[%c32, %c0_53], %125 {strides = array<i32>} : memref<64x1xf32, #tpu.memory_space<vmem>>, vector<8x1xf32>,
    %c5 = arith.constant 5 : index
    %c0_54 = arith.constant 0 : index
    %127 = vector.load %arg1[%c5, %c0_54] : memref<8x32xf32, #tpu.memory_space<vmem>>, vector<1x32xf32>
    %128 = vector.broadcast %127 : vector<1x32xf32> to vector<8x32xf32>
    %129 = arith.addf %0, %128 : vector<8x32xf32>
    %cst_55 = arith.constant 0.000000e+00 : f32
    %130 = vector.broadcast %cst_55 : f32 to vector<8x32xf32>
    %131 = arith.maximumf %129, %130 : vector<8x32xf32>
    %132 = arith.truncf %131 : vector<8x32xf32> to vector<8x32xbf16>
    %cst_56 = arith.constant dense<0.000000e+00> : vector<8x32xf32>
    %133 = tpu.matmul %132, %1, %cst_56 {dimension_numbers = #tpu.dot_dimension_numbers<[1], [0], [0], [1], [0, 0, 1, 1], [], []>} : vector<8x32xbf16>, vector<32x32xbf16>, vector<8x32xf32> -> vector<8x32xf32>
    %134 = vector.broadcast %2 : vector<1x32xf32> to vector<8x32xf32>
    %135 = arith.addf %133, %134 : vector<8x32xf32>
    %cst_57 = arith.constant 0.000000e+00 : f32
    %136 = vector.broadcast %cst_57 : f32 to vector<8x32xf32>
    %137 = arith.maximumf %135, %136 : vector<8x32xf32>
    %138 = arith.truncf %137 : vector<8x32xf32> to vector<8x32xbf16>
    %cst_58 = arith.constant dense<0.000000e+00> : vector<8x32xf32>
    %139 = tpu.matmul %138, %3, %cst_58 {dimension_numbers = #tpu.dot_dimension_numbers<[1], [0], [0], [1], [0, 0, 1, 1], [], []>} : vector<8x32xbf16>, vector<32x32xbf16>, vector<8x32xf32> -> vector<8x32xf32>
    %140 = vector.broadcast %4 : vector<1x32xf32> to vector<8x32xf32>
    %141 = arith.addf %139, %140 : vector<8x32xf32>
    %cst_59 = arith.constant 0.000000e+00 : f32
    %142 = vector.broadcast %cst_59 : f32 to vector<8x32xf32>
    %143 = arith.maximumf %141, %142 : vector<8x32xf32>
    %144 = vector.broadcast %5 : vector<1x32xf32> to vector<8x32xf32>
    %145 = arith.mulf %143, %144 : vector<8x32xf32>
    %cst_60 = arith.constant dense<0.000000e+00> : vector<8xf32>
    %146 = vector.multi_reduction <add>, %145, %cst_60 [1] : vector<8x32xf32> to vector<8xf32>
    %147 = vector.shape_cast %146 : vector<8xf32> to vector<8x1xf32>
    %148 = vector.broadcast %6 : vector<1x1xf32> to vector<8x1xf32>
    %149 = arith.addf %147, %148 : vector<8x1xf32>
    %c40 = arith.constant 40 : index
    %c0_61 = arith.constant 0 : index
    %150 = vector.load %arg9[%c40, %c0_61] : memref<64x1xf32, #tpu.memory_space<vmem>>, vector<8x1xf32>
    tpu.vector_store %arg9[%c40, %c0_61], %149 {strides = array<i32>} : memref<64x1xf32, #tpu.memory_space<vmem>>, vector<8x1xf32>,
    %c6 = arith.constant 6 : index
    %c0_62 = arith.constant 0 : index
    %151 = vector.load %arg1[%c6, %c0_62] : memref<8x32xf32, #tpu.memory_space<vmem>>, vector<1x32xf32>
    %152 = vector.broadcast %151 : vector<1x32xf32> to vector<8x32xf32>
    %153 = arith.addf %0, %152 : vector<8x32xf32>
    %cst_63 = arith.constant 0.000000e+00 : f32
    %154 = vector.broadcast %cst_63 : f32 to vector<8x32xf32>
    %155 = arith.maximumf %153, %154 : vector<8x32xf32>
    %156 = arith.truncf %155 : vector<8x32xf32> to vector<8x32xbf16>
    %cst_64 = arith.constant dense<0.000000e+00> : vector<8x32xf32>
    %157 = tpu.matmul %156, %1, %cst_64 {dimension_numbers = #tpu.dot_dimension_numbers<[1], [0], [0], [1], [0, 0, 1, 1], [], []>} : vector<8x32xbf16>, vector<32x32xbf16>, vector<8x32xf32> -> vector<8x32xf32>
    %158 = vector.broadcast %2 : vector<1x32xf32> to vector<8x32xf32>
    %159 = arith.addf %157, %158 : vector<8x32xf32>
    %cst_65 = arith.constant 0.000000e+00 : f32
    %160 = vector.broadcast %cst_65 : f32 to vector<8x32xf32>
    %161 = arith.maximumf %159, %160 : vector<8x32xf32>
    %162 = arith.truncf %161 : vector<8x32xf32> to vector<8x32xbf16>
    %cst_66 = arith.constant dense<0.000000e+00> : vector<8x32xf32>
    %163 = tpu.matmul %162, %3, %cst_66 {dimension_numbers = #tpu.dot_dimension_numbers<[1], [0], [0], [1], [0, 0, 1, 1], [], []>} : vector<8x32xbf16>, vector<32x32xbf16>, vector<8x32xf32> -> vector<8x32xf32>
    %164 = vector.broadcast %4 : vector<1x32xf32> to vector<8x32xf32>
    %165 = arith.addf %163, %164 : vector<8x32xf32>
    %cst_67 = arith.constant 0.000000e+00 : f32
    %166 = vector.broadcast %cst_67 : f32 to vector<8x32xf32>
    %167 = arith.maximumf %165, %166 : vector<8x32xf32>
    %168 = vector.broadcast %5 : vector<1x32xf32> to vector<8x32xf32>
    %169 = arith.mulf %167, %168 : vector<8x32xf32>
    %cst_68 = arith.constant dense<0.000000e+00> : vector<8xf32>
    %170 = vector.multi_reduction <add>, %169, %cst_68 [1] : vector<8x32xf32> to vector<8xf32>
    %171 = vector.shape_cast %170 : vector<8xf32> to vector<8x1xf32>
    %172 = vector.broadcast %6 : vector<1x1xf32> to vector<8x1xf32>
    %173 = arith.addf %171, %172 : vector<8x1xf32>
    %c48 = arith.constant 48 : index
    %c0_69 = arith.constant 0 : index
    %174 = vector.load %arg9[%c48, %c0_69] : memref<64x1xf32, #tpu.memory_space<vmem>>, vector<8x1xf32>
    tpu.vector_store %arg9[%c48, %c0_69], %173 {strides = array<i32>} : memref<64x1xf32, #tpu.memory_space<vmem>>, vector<8x1xf32>,
    %c7 = arith.constant 7 : index
    %c0_70 = arith.constant 0 : index
    %175 = vector.load %arg1[%c7, %c0_70] : memref<8x32xf32, #tpu.memory_space<vmem>>, vector<1x32xf32>
    %176 = vector.broadcast %175 : vector<1x32xf32> to vector<8x32xf32>
    %177 = arith.addf %0, %176 : vector<8x32xf32>
    %cst_71 = arith.constant 0.000000e+00 : f32
    %178 = vector.broadcast %cst_71 : f32 to vector<8x32xf32>
    %179 = arith.maximumf %177, %178 : vector<8x32xf32>
    %180 = arith.truncf %179 : vector<8x32xf32> to vector<8x32xbf16>
    %cst_72 = arith.constant dense<0.000000e+00> : vector<8x32xf32>
    %181 = tpu.matmul %180, %1, %cst_72 {dimension_numbers = #tpu.dot_dimension_numbers<[1], [0], [0], [1], [0, 0, 1, 1], [], []>} : vector<8x32xbf16>, vector<32x32xbf16>, vector<8x32xf32> -> vector<8x32xf32>
    %182 = vector.broadcast %2 : vector<1x32xf32> to vector<8x32xf32>
    %183 = arith.addf %181, %182 : vector<8x32xf32>
    %cst_73 = arith.constant 0.000000e+00 : f32
    %184 = vector.broadcast %cst_73 : f32 to vector<8x32xf32>
    %185 = arith.maximumf %183, %184 : vector<8x32xf32>
    %186 = arith.truncf %185 : vector<8x32xf32> to vector<8x32xbf16>
    %cst_74 = arith.constant dense<0.000000e+00> : vector<8x32xf32>
    %187 = tpu.matmul %186, %3, %cst_74 {dimension_numbers = #tpu.dot_dimension_numbers<[1], [0], [0], [1], [0, 0, 1, 1], [], []>} : vector<8x32xbf16>, vector<32x32xbf16>, vector<8x32xf32> -> vector<8x32xf32>
    %188 = vector.broadcast %4 : vector<1x32xf32> to vector<8x32xf32>
    %189 = arith.addf %187, %188 : vector<8x32xf32>
    %cst_75 = arith.constant 0.000000e+00 : f32
    %190 = vector.broadcast %cst_75 : f32 to vector<8x32xf32>
    %191 = arith.maximumf %189, %190 : vector<8x32xf32>
    %192 = vector.broadcast %5 : vector<1x32xf32> to vector<8x32xf32>
    %193 = arith.mulf %191, %192 : vector<8x32xf32>
    %cst_76 = arith.constant dense<0.000000e+00> : vector<8xf32>
    %194 = vector.multi_reduction <add>, %193, %cst_76 [1] : vector<8x32xf32> to vector<8xf32>
    %195 = vector.shape_cast %194 : vector<8xf32> to vector<8x1xf32>
    %196 = vector.broadcast %6 : vector<1x1xf32> to vector<8x1xf32>
    %197 = arith.addf %195, %196 : vector<8x1xf32>
    %c56 = arith.constant 56 : index
    %c0_77 = arith.constant 0 : index
    %198 = vector.load %arg9[%c56, %c0_77] : memref<64x1xf32, #tpu.memory_space<vmem>>, vector<8x1xf32>
    tpu.vector_store %arg9[%c56, %c0_77], %197 {strides = array<i32>} : memref<64x1xf32, #tpu.memory_space<vmem>>, vector<8x1xf32>,
    return
  }
  func.func @transform_0(%arg0: i32) -> (i32, i32) {
    %c0_i32 = arith.constant 0 : i32
    %c0_i32_0 = arith.constant 0 : i32
    return %arg0, %c0_i32 : i32, i32
  }
  func.func @transform_1(%arg0: i32) -> (i32, i32) {
    %c0_i32 = arith.constant 0 : i32
    %c0_i32_0 = arith.constant 0 : i32
    %c0_i32_1 = arith.constant 0 : i32
    return %c0_i32, %c0_i32_0 : i32, i32
  }
  func.func @transform_2(%arg0: i32) -> (i32, i32) {
    %c0_i32 = arith.constant 0 : i32
    %c0_i32_0 = arith.constant 0 : i32
    %c0_i32_1 = arith.constant 0 : i32
    return %c0_i32, %c0_i32_0 : i32, i32
  }
  func.func @transform_3(%arg0: i32) -> (i32, i32) {
    %c0_i32 = arith.constant 0 : i32
    %c0_i32_0 = arith.constant 0 : i32
    %c0_i32_1 = arith.constant 0 : i32
    return %c0_i32, %c0_i32_0 : i32, i32
  }
  func.func @transform_4(%arg0: i32) -> (i32, i32) {
    %c0_i32 = arith.constant 0 : i32
    %c0_i32_0 = arith.constant 0 : i32
    %c0_i32_1 = arith.constant 0 : i32
    return %c0_i32, %c0_i32_0 : i32, i32
  }
  func.func @transform_5(%arg0: i32) -> (i32, i32) {
    %c0_i32 = arith.constant 0 : i32
    %c0_i32_0 = arith.constant 0 : i32
    %c0_i32_1 = arith.constant 0 : i32
    return %c0_i32, %c0_i32_0 : i32, i32
  }
  func.func @transform_6(%arg0: i32) -> (i32, i32) {
    %c0_i32 = arith.constant 0 : i32
    %c0_i32_0 = arith.constant 0 : i32
    %c0_i32_1 = arith.constant 0 : i32
    return %c0_i32, %c0_i32_0 : i32, i32
  }
  func.func @transform_7(%arg0: i32) -> (i32, i32) {
    %c0_i32 = arith.constant 0 : i32
    %c0_i32_0 = arith.constant 0 : i32
    %c0_i32_1 = arith.constant 0 : i32
    return %c0_i32, %c0_i32_0 : i32, i32
  }
  func.func @transform_8(%arg0: i32) -> (i32, i32) {
    %c0_i32 = arith.constant 0 : i32
    %c0_i32_0 = arith.constant 0 : i32
    return %arg0, %c0_i32 : i32, i32
  }
}

</mosaic_0001>

<bundles_post_ra>
// kernel: concat_critic_forward.1
= control target key start
LH: loop header
LB: loop body
LE: loop exit
PB: predicated region body
PF: predicated region fallthrough
CT: control target
= control target key end

     0   :  { %v1137_v0 = vmov 0.0   ;;  %vm1138_vm0 = vmmov 0   ;;  %vm71_vm1 = vcmask 261120   ;;  %vm196_vm2 = vcmask 7168   ;;  %s1435_s2 = inlined_call_operand.vmem [shape: bf16[32,32], index: 2, kind: input, shape index: {}]   ;;  %s1436_s0 = inlined_call_operand.vmem [shape: f32[8,32], index: 0, kind: input, shape index: {}]   ;;  %s1437_s1 = inlined_call_operand.vmem [shape: f32[8,32], index: 1, kind: input, shape index: {}]   ;;  %s1438_s4 = inlined_call_operand.vmem [shape: bf16[32,32], index: 4, kind: input, shape index: {}]   ;;  %s1439_s3 = inlined_call_operand.vmem [shape: f32[1,32], index: 3, kind: input, shape index: {}]   ;;  %s1440_s7 = inlined_call_operand.<no memory space> [shape: f32[1,1], index: 7, kind: input, shape index: {}]   ;;  %s1441_s5 = inlined_call_operand.vmem [shape: f32[1,32], index: 5, kind: input, shape index: {}]   ;;  %s1442_s6 = inlined_call_operand.vmem [shape: f32[1,32], index: 6, kind: input, shape index: {}]   ;;  %s1443_s8 = inlined_call_operand.vmem [shape: f32[64,1], index: 8, kind: output, shape index: {}]  }
   0x1   :  { %1003 = vmatprep.subr.bf16.mxu0 %v1137_v0  ;;  %v1188_v1 = vld [vmem:[%s1435_s2] sm:$0xff]   ;;  %1007 = vmatprep.mubr.msk.bf16.mxu0 %vm1138_vm0, %v1137_v0  ;;  %v1195_v2 = vld [vmem:[%s1435_s2 + $0x8] sm:$0xff]  }
   0x2   :  { %1011 = vmatprep.subr.bf16.mxu1 %v1137_v0  ;;  %1015 = vmatprep.mubr.msk.bf16.mxu1 %vm1138_vm0, %v1137_v0  ;;  %v1204_v3 = vld [vmem:[%s1437_s1] sm:$0xff]  ;;  %v1300_v37 = vld [vmem:[%s1438_s4 + $0x8] sm:$0xff]  }
   0x3   :  { %1004 = vmatpush3.bf16.msra.mxu0 %v1188_v1  ;;  %v923_v4 = vld [vmem:[%s1436_s0] ss:$0 sm:$0xff]  ;;  %v934_v5 = vld [vmem:[%s1436_s0 + $0x1] ss:$0 sm:$0xff]  ;;  %v937_v11 = vld [vmem:[%s1436_s0 + $0x2] ss:$0 sm:$0xff] }
   0x4   :  { %1005 = vmatprep.subr.bf16.mxu0 %v1137_v0  ;;  %v50_v6 = vadd.f32 %v923_v4, %v1204_v3  ;;  %v203_v8 = vadd.f32 %v934_v5, %v1204_v3  ;;  %v306_v13 = vadd.f32 %v937_v11, %v1204_v3  ;;  %v940_v15 = vld [vmem:[%s1436_s0 + $0x3] ss:$0 sm:$0xff]  ;;  %v943_v19 = vld [vmem:[%s1436_s0 + $0x4] ss:$0 sm:$0xff]  ;;  %v946_v23 = vld [vmem:[%s1436_s0 + $0x5] ss:$0 sm:$0xff] }
   0x5   :  { %v409_v17 = vadd.f32 %v940_v15, %v1204_v3  ;;  %v512_v21 = vadd.f32 %v943_v19, %v1204_v3  ;;  %v615_v25 = vadd.f32 %v946_v23, %v1204_v3  ;;  %v949_v27 = vld [vmem:[%s1436_s0 + $0x6] ss:$0 sm:$0xff]  ;;  %v952_v31 = vld [vmem:[%s1436_s0 + $0x7] ss:$0 sm:$0xff]  ;;  %v1307_v38 = vld [vmem:[%s1439_s3] ss:$0 sm:$0xff] }
   0x6   :  { %v51_v7 = vmax.f32 %v50_v6, 0.0  ;;  %v204_v10 = vmax.f32 %v203_v8, 0.0  ;;  %v307_v14 = vmax.f32 %v306_v13, 0.0  ;;  %v718_v29 = vadd.f32 %v949_v27, %v1204_v3  ;;  %v1293_v36 = vld [vmem:[%s1438_s4] sm:$0xff]  }
   0x7   :  { %1006 = vmatpush3.bf16.msra.mxu0 %v1195_v2  ;;  %v410_v18 = vmax.f32 %v409_v17, 0.0  ;;  %v513_v22 = vmax.f32 %v512_v21, 0.0  ;;  %v616_v26 = vmax.f32 %v615_v25, 0.0  ;;  %v821_v33 = vadd.f32 %v952_v31, %v1204_v3  ;;  %1012 = vmatpush3.bf16.msra.mxu1 %v1293_v36 }
   0x8   :  { %v52_v9 = vpack.c.bf16 %v51_v7, %v51_v7  ;;  %1019 = vmatprep.subr.bf16.mxu0 %v1137_v0  ;;  %v205_v12 = vpack.c.bf16 %v204_v10, %v204_v10  ;;  %v308_v16 = vpack.c.bf16 %v307_v14, %v307_v14  ;;  %v719_v30 = vmax.f32 %v718_v29, 0.0  ;;  %1013 = vmatprep.subr.bf16.mxu1 %v1137_v0 }
   0x9   :  { %v411_v20 = vpack.c.bf16 %v410_v18, %v410_v18  ;;  %v514_v24 = vpack.c.bf16 %v513_v22, %v513_v22  ;;  %v617_v28 = vpack.c.bf16 %v616_v26, %v616_v26  ;;  %v822_v34 = vmax.f32 %v821_v33, 0.0  ;;  %v1372_v33 = vld [vmem:[%s1441_s5] ss:$0 sm:$0xff] }
   0xa   :  { %1008 = vmatmul.mubr.msk.bf16.vlgmr.msra.gmra.mrb[0].mxu0 %vm71_vm1, %v52_v9  ;;  %v720_v32 = vpack.c.bf16 %v719_v30, %v719_v30 }
   0xb   :  { %1020 = vmatpush3.bf16.msra.mxu0 %v1188_v1  ;;  %1023 = vmatprep.mubr.msk.bf16.mxu0 %vm1138_vm0, %v1137_v0  ;;  %v823_v35 = vpack.c.bf16 %v822_v34, %v822_v34 }
   0xc   :  { %1021 = vmatprep.subr.bf16.mxu0 %v1137_v0  ;;  %1014 = vmatpush3.bf16.msra.mxu1 %v1300_v37 }
   0xd   :  { %1027 = vmatprep.subr.bf16.mxu1 %v1137_v0 }
   0xf   :  { %1022 = vmatpush3.bf16.msra.mxu0 %v1195_v2 }
  0x10   :  { %1035 = vmatprep.subr.bf16.mxu0 %v1137_v0 }
  0x12   :  { %1024 = vmatmul.mubr.msk.bf16.vlgmr.msra.gmra.mrb[4].mxu0 %vm71_vm1, %v205_v12 }
  0x13   :  { %1036 = vmatpush3.bf16.msra.mxu0 %v1188_v1  ;;  %1039 = vmatprep.mubr.msk.bf16.mxu0 %vm1138_vm0, %v1137_v0 }
  0x14   :  { %1037 = vmatprep.subr.bf16.mxu0 %v1137_v0 }
  0x17   :  { %1038 = vmatpush3.bf16.msra.mxu0 %v1195_v2 }
  0x18   :  { %1051 = vmatprep.subr.bf16.mxu0 %v1137_v0 }
  0x1a   :  { %1040 = vmatmul.mubr.msk.bf16.vlgmr.msra.gmra.mrb[8].mxu0 %vm71_vm1, %v308_v16 }
  0x1b   :  { %1052 = vmatpush3.bf16.msra.mxu0 %v1188_v1  ;;  %1055 = vmatprep.mubr.msk.bf16.mxu0 %vm1138_vm0, %v1137_v0 }
  0x1c   :  { %1053 = vmatprep.subr.bf16.mxu0 %v1137_v0 }
  0x1f   :  { %1054 = vmatpush3.bf16.msra.mxu0 %v1195_v2 }
  0x20   :  { %1067 = vmatprep.subr.bf16.mxu0 %v1137_v0 }
  0x22   :  { %1056 = vmatmul.mubr.msk.bf16.vlgmr.msra.gmra.mrb[12].mxu0 %vm71_vm1, %v411_v20 }
  0x23   :  { %1068 = vmatpush3.bf16.msra.mxu0 %v1188_v1  ;;  %1071 = vmatprep.mubr.msk.bf16.mxu0 %vm1138_vm0, %v1137_v0 }
  0x24   :  { %1069 = vmatprep.subr.bf16.mxu0 %v1137_v0 }
  0x27   :  { %1070 = vmatpush3.bf16.msra.mxu0 %v1195_v2 }
  0x28   :  { %1083 = vmatprep.subr.bf16.mxu0 %v1137_v0 }
  0x2a   :  { %1072 = vmatmul.mubr.msk.bf16.vlgmr.msra.gmra.mrb[16].mxu0 %vm71_vm1, %v514_v24 }
  0x2b   :  { %1084 = vmatpush3.bf16.msra.mxu0 %v1188_v1  ;;  %1087 = vmatprep.mubr.msk.bf16.mxu0 %vm1138_vm0, %v1137_v0 }
  0x2c   :  { %1085 = vmatprep.subr.bf16.mxu0 %v1137_v0 }
  0x2f   :  { %1086 = vmatpush3.bf16.msra.mxu0 %v1195_v2 }
  0x30   :  { %1099 = vmatprep.subr.bf16.mxu0 %v1137_v0 }
  0x32   :  { %1088 = vmatmul.mubr.msk.bf16.vlgmr.msra.gmra.mrb[20].mxu0 %vm71_vm1, %v617_v28 }
  0x33   :  { %1100 = vmatpush3.bf16.msra.mxu0 %v1188_v1  ;;  %1103 = vmatprep.mubr.msk.bf16.mxu0 %vm1138_vm0, %v1137_v0 }
  0x34   :  { %1101 = vmatprep.subr.bf16.mxu0 %v1137_v0 }
  0x37   :  { %1102 = vmatpush3.bf16.msra.mxu0 %v1195_v2 }
  0x38   :  { %1115 = vmatprep.subr.bf16.mxu0 %v1137_v0 }
  0x3a   :  { %1104 = vmatmul.mubr.msk.bf16.vlgmr.msra.gmra.mrb[24].mxu0 %vm71_vm1, %v720_v32  ;;  %v13_v32 = vstv %s1440_s7 }
  0x3b   :  { %1116 = vmatpush3.bf16.msra.mxu0 %v1188_v1  ;;  %1119 = vmatprep.mubr.msk.bf16.mxu0 %vm1138_vm0, %v1137_v0  ;;  %14 = vst [vmem:[#allocation2] sm:$0x1] %v13_v32 }
  0x3c   :  { %1117 = vmatprep.subr.bf16.mxu0 %v1137_v0 }
  0x3f   :  { %1118 = vmatpush3.bf16.msra.mxu0 %v1195_v2 }
  0x42   :  { %1120 = vmatmul.mubr.msk.bf16.vlgmr.msra.gmra.mrb[28].mxu0 %vm71_vm1, %v823_v35 }
  0xdd   :  { %v109_v39 = vpop.f32.mrb[0].mxu0 }
  0xde   :  { %v110_v40 = vadd.f32 %v1307_v38, %v109_v39  ;;  %v1009_v41 = vpop.f32.mrb[1].mxu0 }
  0xdf   :  { %v112_v42 = vpop.f32.mrb[2].mxu0 }
  0xe0   :  { %v115_v43 = vmax.f32 %v110_v40, 0.0  ;;  %v1010_v44 = vpop.f32.mrb[3].mxu0 }
  0xe2   :  { %v116_v45 = vpack.c.bf16 %v115_v43, %v115_v43 }
  0xe4   :  { %1016 = vmatmul.mubr.msk.bf16.vlgmr.msra.gmra.mrb[0].mxu1 %vm71_vm1, %v116_v45 }
  0xe5   :  { %v243_v46 = vpop.f32.mrb[4].mxu0  ;;  %1028 = vmatpush3.bf16.msra.mxu1 %v1293_v36  ;;  %1031 = vmatprep.mubr.msk.bf16.mxu1 %vm1138_vm0, %v1137_v0 }
  0xe6   :  { %v244_v47 = vadd.f32 %v1307_v38, %v243_v46  ;;  %v1025_v48 = vpop.f32.mrb[5].mxu0  ;;  %1029 = vmatprep.subr.bf16.mxu1 %v1137_v0 }
  0xe7   :  { %v246_v49 = vpop.f32.mrb[6].mxu0 }
  0xe8   :  { %v249_v50 = vmax.f32 %v244_v47, 0.0  ;;  %v1026_v51 = vpop.f32.mrb[7].mxu0 }
  0xe9   :  { %1030 = vmatpush3.bf16.msra.mxu1 %v1300_v37 }
  0xea   :  { %v250_v52 = vpack.c.bf16 %v249_v50, %v249_v50  ;;  %1043 = vmatprep.subr.bf16.mxu1 %v1137_v0 }
  0xec   :  { %1032 = vmatmul.mubr.msk.bf16.vlgmr.msra.gmra.mrb[4].mxu1 %vm71_vm1, %v250_v52 }
  0xed   :  { %v346_v53 = vpop.f32.mrb[8].mxu0  ;;  %1044 = vmatpush3.bf16.msra.mxu1 %v1293_v36  ;;  %1047 = vmatprep.mubr.msk.bf16.mxu1 %vm1138_vm0, %v1137_v0 }
  0xee   :  { %v347_v54 = vadd.f32 %v1307_v38, %v346_v53  ;;  %v1041_v55 = vpop.f32.mrb[9].mxu0  ;;  %1045 = vmatprep.subr.bf16.mxu1 %v1137_v0 }
  0xef   :  { %v349_v56 = vpop.f32.mrb[10].mxu0 }
  0xf0   :  { %v352_v57 = vmax.f32 %v347_v54, 0.0  ;;  %v1042_v58 = vpop.f32.mrb[11].mxu0 }
  0xf1   :  { %1046 = vmatpush3.bf16.msra.mxu1 %v1300_v37 }
  0xf2   :  { %v353_v59 = vpack.c.bf16 %v352_v57, %v352_v57  ;;  %1059 = vmatprep.subr.bf16.mxu1 %v1137_v0 }
  0xf4   :  { %1048 = vmatmul.mubr.msk.bf16.vlgmr.msra.gmra.mrb[8].mxu1 %vm71_vm1, %v353_v59 }
  0xf5   :  { %v449_v60 = vpop.f32.mrb[12].mxu0  ;;  %1060 = vmatpush3.bf16.msra.mxu1 %v1293_v36  ;;  %1063 = vmatprep.mubr.msk.bf16.mxu1 %vm1138_vm0, %v1137_v0 }
  0xf6   :  { %v450_v61 = vadd.f32 %v1307_v38, %v449_v60  ;;  %v1057_v62 = vpop.f32.mrb[13].mxu0  ;;  %1061 = vmatprep.subr.bf16.mxu1 %v1137_v0 }
  0xf7   :  { %v452_v63 = vpop.f32.mrb[14].mxu0 }
  0xf8   :  { %v455_v1 = vmax.f32 %v450_v61, 0.0  ;;  %v1058_v2 = vpop.f32.mrb[15].mxu0 }
  0xf9   :  { %1062 = vmatpush3.bf16.msra.mxu1 %v1300_v37 }
  0xfa   :  { %v456_v3 = vpack.c.bf16 %v455_v1, %v455_v1  ;;  %1075 = vmatprep.subr.bf16.mxu1 %v1137_v0 }
  0xfc   :  { %1064 = vmatmul.mubr.msk.bf16.vlgmr.msra.gmra.mrb[12].mxu1 %vm71_vm1, %v456_v3 }
  0xfd   :  { %v552_v4 = vpop.f32.mrb[16].mxu0  ;;  %1076 = vmatpush3.bf16.msra.mxu1 %v1293_v36  ;;  %1079 = vmatprep.mubr.msk.bf16.mxu1 %vm1138_vm0, %v1137_v0 }
  0xfe   :  { %v553_v5 = vadd.f32 %v1307_v38, %v552_v4  ;;  %v1073_v6 = vpop.f32.mrb[17].mxu0  ;;  %1077 = vmatprep.subr.bf16.mxu1 %v1137_v0 }
  0xff   :  { %v555_v7 = vpop.f32.mrb[18].mxu0 }
 0x100   :  { %v558_v8 = vmax.f32 %v553_v5, 0.0  ;;  %v1074_v9 = vpop.f32.mrb[19].mxu0 }
 0x101   :  { %1078 = vmatpush3.bf16.msra.mxu1 %v1300_v37 }
 0x102   :  { %v559_v10 = vpack.c.bf16 %v558_v8, %v558_v8  ;;  %1091 = vmatprep.subr.bf16.mxu1 %v1137_v0 }
 0x104   :  { %1080 = vmatmul.mubr.msk.bf16.vlgmr.msra.gmra.mrb[16].mxu1 %vm71_vm1, %v559_v10 }
 0x105   :  { %v655_v11 = vpop.f32.mrb[20].mxu0  ;;  %1092 = vmatpush3.bf16.msra.mxu1 %v1293_v36  ;;  %1095 = vmatprep.mubr.msk.bf16.mxu1 %vm1138_vm0, %v1137_v0 }
 0x106   :  { %v656_v12 = vadd.f32 %v1307_v38, %v655_v11  ;;  %v1089_v13 = vpop.f32.mrb[21].mxu0  ;;  %1093 = vmatprep.subr.bf16.mxu1 %v1137_v0 }
 0x107   :  { %v658_v14 = vpop.f32.mrb[22].mxu0 }
 0x108   :  { %v661_v15 = vmax.f32 %v656_v12, 0.0  ;;  %v1090_v16 = vpop.f32.mrb[23].mxu0 }
 0x109   :  { %1094 = vmatpush3.bf16.msra.mxu1 %v1300_v37 }
 0x10a   :  { %v662_v17 = vpack.c.bf16 %v661_v15, %v661_v15  ;;  %1107 = vmatprep.subr.bf16.mxu1 %v1137_v0 }
 0x10c   :  { %1096 = vmatmul.mubr.msk.bf16.vlgmr.msra.gmra.mrb[20].mxu1 %vm71_vm1, %v662_v17 }
 0x10d   :  { %v758_v18 = vpop.f32.mrb[24].mxu0  ;;  %1108 = vmatpush3.bf16.msra.mxu1 %v1293_v36  ;;  %1111 = vmatprep.mubr.msk.bf16.mxu1 %vm1138_vm0, %v1137_v0 }
 0x10e   :  { %v759_v19 = vadd.f32 %v1307_v38, %v758_v18  ;;  %v1105_v20 = vpop.f32.mrb[25].mxu0  ;;  %1109 = vmatprep.subr.bf16.mxu1 %v1137_v0 }
 0x10f   :  { %v761_v21 = vpop.f32.mrb[26].mxu0 }
 0x110   :  { %v764_v22 = vmax.f32 %v759_v19, 0.0  ;;  %v1106_v23 = vpop.f32.mrb[27].mxu0 }
 0x111   :  { %1110 = vmatpush3.bf16.msra.mxu1 %v1300_v37 }
 0x112   :  { %v765_v24 = vpack.c.bf16 %v764_v22, %v764_v22  ;;  %1123 = vmatprep.subr.bf16.mxu1 %v1137_v0 }
 0x114   :  { %1112 = vmatmul.mubr.msk.bf16.vlgmr.msra.gmra.mrb[24].mxu1 %vm71_vm1, %v765_v24 }
 0x115   :  { %v861_v25 = vpop.f32.mrb[28].mxu0  ;;  %1124 = vmatpush3.bf16.msra.mxu1 %v1293_v36  ;;  %1127 = vmatprep.mubr.msk.bf16.mxu1 %vm1138_vm0, %v1137_v0 }
 0x116   :  { %v862_v26 = vadd.f32 %v1307_v38, %v861_v25  ;;  %v1121_v27 = vpop.f32.mrb[29].mxu0  ;;  %1125 = vmatprep.subr.bf16.mxu1 %v1137_v0 }
 0x117   :  { %v864_v28 = vpop.f32.mrb[30].mxu0 }
 0x118   :  { %v867_v29 = vmax.f32 %v862_v26, 0.0  ;;  %v1122_v30 = vpop.f32.mrb[31].mxu0 }
 0x119   :  { %1126 = vmatpush3.bf16.msra.mxu1 %v1300_v37  ;;  %v1378_v37 = vld [vmem:[%s1442_s6] ss:$0 sm:$0xff] }
 0x11a   :  { %v868_v31 = vpack.c.bf16 %v867_v29, %v867_v29 }
 0x11c   :  { %1128 = vmatmul.mubr.msk.bf16.vlgmr.msra.gmra.mrb[28].mxu1 %vm71_vm1, %v868_v31 }
 0x1b7   :  { %v172_v34 = vpop.f32.mrb[0].mxu1 }
 0x1b8   :  { %v173_v0 = vadd.f32 %v1372_v33, %v172_v34  ;;  %v1017_v35 = vpop.f32.mrb[1].mxu1 }
 0x1b9   :  { %v175_v36 = vpop.f32.mrb[2].mxu1  ;;  %v933_v35 = vld [vmem:[#allocation2] ss:$0 sm:$0xff] }
 0x1ba   :  { %v178_v38 = vmax.f32 %v173_v0, 0.0  ;;  %v1018_v39 = vpop.f32.mrb[3].mxu1 }
 0x1bc   :  { %v185_v40 = vmul.f32 %v1378_v37, %v178_v38 }
 0x1be   :  { %v186_v41 = vsel %vm71_vm1, %v185_v40, 0.0 }
 0x1bf   :  { %v288_v42 = vpop.f32.mrb[4].mxu1  ;;  %187 = vadd.xlane.f32.xlu0 %v186_v41 }
 0x1c0   :  { %v289_v43 = vadd.f32 %v1372_v33, %v288_v42  ;;  %v1033_v44 = vpop.f32.mrb[5].mxu1 }
 0x1c1   :  { %v291_v45 = vpop.f32.mrb[6].mxu1 }
 0x1c2   :  { %v294_v46 = vmax.f32 %v289_v43, 0.0  ;;  %v1034_v47 = vpop.f32.mrb[7].mxu1 }
 0x1c4   :  { %v295_v48 = vmul.f32 %v1378_v37, %v294_v46 }
 0x1c6   :  { %v296_v49 = vsel %vm71_vm1, %v295_v48, 0.0 }
 0x1c7   :  { %v391_v50 = vpop.f32.mrb[8].mxu1  ;;  %297 = vadd.xlane.f32.xlu0 %v296_v49 }
 0x1c8   :  { %v392_v51 = vadd.f32 %v1372_v33, %v391_v50  ;;  %v1049_v52 = vpop.f32.mrb[9].mxu1 }
 0x1c9   :  { %v394_v53 = vpop.f32.mrb[10].mxu1 }
 0x1ca   :  { %v397_v54 = vmax.f32 %v392_v51, 0.0  ;;  %v1050_v55 = vpop.f32.mrb[11].mxu1 }
 0x1cc   :  { %v398_v56 = vmul.f32 %v1378_v37, %v397_v54 }
 0x1ce   :  { %v399_v57 = vsel %vm71_vm1, %v398_v56, 0.0 }
 0x1cf   :  { %v494_v58 = vpop.f32.mrb[12].mxu1  ;;  %400 = vadd.xlane.f32.xlu1 %v399_v57 }
 0x1d0   :  { %v495_v59 = vadd.f32 %v1372_v33, %v494_v58  ;;  %v1065_v60 = vpop.f32.mrb[13].mxu1 }
 0x1d1   :  { %v497_v61 = vpop.f32.mrb[14].mxu1 }
 0x1d2   :  { %v500_v62 = vmax.f32 %v495_v59, 0.0  ;;  %v1066_v63 = vpop.f32.mrb[15].mxu1 }
 0x1d4   :  { %v501_v1 = vmul.f32 %v1378_v37, %v500_v62 }
 0x1d6   :  { %v502_v2 = vsel %vm71_vm1, %v501_v1, 0.0 }
 0x1d7   :  { %v597_v3 = vpop.f32.mrb[16].mxu1  ;;  %503 = vadd.xlane.f32.xlu1 %v502_v2 }
 0x1d8   :  { %v598_v4 = vadd.f32 %v1372_v33, %v597_v3  ;;  %v1081_v5 = vpop.f32.mrb[17].mxu1 }
 0x1d9   :  { %v600_v6 = vpop.f32.mrb[18].mxu1 }
 0x1da   :  { %v603_v7 = vmax.f32 %v598_v4, 0.0  ;;  %v1082_v8 = vpop.f32.mrb[19].mxu1 }
 0x1dc   :  { %v604_v9 = vmul.f32 %v1378_v37, %v603_v7 }
 0x1de   :  { %v605_v10 = vsel %vm71_vm1, %v604_v9, 0.0 }
 0x1df   :  { %v700_v11 = vpop.f32.mrb[20].mxu1  ;;  %606 = vadd.xlane.f32.xlu0 %v605_v10 }
 0x1e0   :  { %v701_v12 = vadd.f32 %v1372_v33, %v700_v11  ;;  %v1097_v13 = vpop.f32.mrb[21].mxu1 }
 0x1e1   :  { %v703_v14 = vpop.f32.mrb[22].mxu1 }
 0x1e2   :  { %v706_v15 = vmax.f32 %v701_v12, 0.0  ;;  %v1098_v16 = vpop.f32.mrb[23].mxu1 }
 0x1e4   :  { %v707_v17 = vmul.f32 %v1378_v37, %v706_v15 }
 0x1e6   :  { %v708_v18 = vsel %vm71_vm1, %v707_v17, 0.0 }
 0x1e7   :  { %v803_v19 = vpop.f32.mrb[24].mxu1  ;;  %709 = vadd.xlane.f32.xlu1 %v708_v18 }
 0x1e8   :  { %v804_v20 = vadd.f32 %v1372_v33, %v803_v19  ;;  %v1113_v21 = vpop.f32.mrb[25].mxu1 }
 0x1e9   :  { %v806_v22 = vpop.f32.mrb[26].mxu1 }
 0x1ea   :  { %v809_v23 = vmax.f32 %v804_v20, 0.0  ;;  %v1114_v24 = vpop.f32.mrb[27].mxu1 }
 0x1ec   :  { %v810_v25 = vmul.f32 %v1378_v37, %v809_v23 }
 0x1ee   :  { %v811_v26 = vsel %vm71_vm1, %v810_v25, 0.0 }
 0x1ef   :  { %v906_v27 = vpop.f32.mrb[28].mxu1  ;;  %812 = vadd.xlane.f32.xlu0 %v811_v26 }
 0x1f0   :  { %v907_v28 = vadd.f32 %v1372_v33, %v906_v27  ;;  %v1129_v29 = vpop.f32.mrb[29].mxu1 }
 0x1f1   :  { %v909_v30 = vpop.f32.mrb[30].mxu1 }
 0x1f2   :  { %v912_v31 = vmax.f32 %v907_v28, 0.0  ;;  %v1130_v32 = vpop.f32.mrb[31].mxu1 }
 0x1f4   :  { %v913_v34 = vmul.f32 %v1378_v37, %v912_v31 }
 0x1f6   :  { %v914_v0 = vsel %vm71_vm1, %v913_v34, 0.0 }
 0x1f7   :  { %915 = vadd.xlane.f32.xlu1 %v914_v0 }
 0x24c   :  { %v188_v36 = vpop.xlane.xlu0 %187 }
 0x24d   :  { %v195_v38 = vadd.f32 %v933_v35, %v188_v36 }
 0x24f   :  { %197 = vst.msk [vmem:[%s1443_s8] sm:$0xff] %vm196_vm2, %v195_v38 }
 0x254   :  { %v298_v39 = vpop.xlane.xlu0 %297 }
 0x255   :  { %v299_v33 = vadd.f32 %v933_v35, %v298_v39 }
 0x257   :  { %300 = vst.msk [vmem:[%s1443_s8 + $0x8] sm:$0xff] %vm196_vm2, %v299_v33 }
 0x25c   :  { %v401_v37 = vpop.xlane.xlu1 %400 }
 0x25d   :  { %v402_v40 = vadd.f32 %v933_v35, %v401_v37 }
 0x25f   :  { %403 = vst.msk [vmem:[%s1443_s8 + $0x10] sm:$0xff] %vm196_vm2, %v402_v40 }
 0x264   :  { %v504_v41 = vpop.xlane.xlu1 %503 }
 0x265   :  { %v505_v42 = vadd.f32 %v933_v35, %v504_v41 }
 0x267   :  { %506 = vst.msk [vmem:[%s1443_s8 + $0x18] sm:$0xff] %vm196_vm2, %v505_v42 }
 0x26c   :  { %v607_v43 = vpop.xlane.xlu0 %606 }
 0x26d   :  { %v608_v44 = vadd.f32 %v933_v35, %v607_v43 }
 0x26f   :  { %609 = vst.msk [vmem:[%s1443_s8 + $0x20] sm:$0xff] %vm196_vm2, %v608_v44 }
 0x274   :  { %v710_v45 = vpop.xlane.xlu1 %709 }
 0x275   :  { %v711_v46 = vadd.f32 %v933_v35, %v710_v45 }
 0x277   :  { %712 = vst.msk [vmem:[%s1443_s8 + $0x28] sm:$0xff] %vm196_vm2, %v711_v46 }
 0x27c   :  { %v813_v47 = vpop.xlane.xlu0 %812 }
 0x27d   :  { %v814_v48 = vadd.f32 %v933_v35, %v813_v47 }
 0x27f   :  { %815 = vst.msk [vmem:[%s1443_s8 + $0x30] sm:$0xff] %vm196_vm2, %v814_v48 }
 0x284   :  { %v916_v49 = vpop.xlane.xlu1 %915 }
 0x285   :  { %v917_v50 = vadd.f32 %v933_v35, %v916_v49 }
 0x287   :  { %918 = vst.msk [vmem:[%s1443_s8 + $0x38] sm:$0xff] %vm196_vm2, %v917_v50 }

</bundles_post_ra>
